<compile_context>
chip_gen: v7x
topology: tpu7x:2x2x1
jax: 0.10.0
libtpu: 0.0.40
codegen_flags: <defaults>
</compile_context>

<pallas_src>
import math
import functools

import jax
import jax.numpy as jnp
from jax.experimental import pallas as pl
from jax.experimental.pallas import tpu as pltpu


_VMEM_LIMIT_BYTES = 48 * 1024 * 1024   # <= v7x 64 MiB physical, > 32 MiB default
_HAS_EINSHAPE = hasattr(pltpu, "einshape")


# --------------------------------------------------------------------------- #
# helpers
# --------------------------------------------------------------------------- #
def _pick_block(n, target, multiple):
    """Largest divisor of n that is <= target and a multiple of `multiple`;
    falls back to n (single full-extent block)."""
    if n <= target:
        return n
    b = (target // multiple) * multiple
    while b >= multiple:
        if n % b == 0:
            return b
        b -= multiple
    return n


def _const_spec(shape):
    """BlockSpec for weights/biases: constant index map, single-buffered
    (double-buffering data whose block never changes only wastes VMEM)."""
    index_map = lambda *_: (0,) * len(shape)
    if hasattr(pl, "Buffered"):
        return pl.BlockSpec(shape, index_map, pipeline_mode=pl.Buffered(1))
    return pl.BlockSpec(shape, index_map)


def _compiler_params(dim_sems):
    return pltpu.CompilerParams(dimension_semantics=dim_sems,
                                vmem_limit_bytes=_VMEM_LIMIT_BYTES)


def _split_heads(x, n_head):
    """(L, D) -> (H, L, dt).  einshape is lane-layout aware (avoids the VMEM
    copies a generic transpose materializes)."""
    l, d = x.shape
    dt = d // n_head
    x = x.reshape(l, n_head, dt)
    if _HAS_EINSHAPE:
        return pltpu.einshape("lhd->hld", x)
    return jnp.transpose(x, (1, 0, 2))


def _merge_heads(x):
    """(H, L, dt) -> (L, H*dt)."""
    h, l, dt = x.shape
    if _HAS_EINSHAPE:
        x = pltpu.einshape("hld->lhd", x)
    else:
        x = jnp.transpose(x, (1, 0, 2))
    return x.reshape(l, h * dt)


# --------------------------------------------------------------------------- #
# kernel 1: fused QKV projection
# --------------------------------------------------------------------------- #
def _qkv_proj_kernel(x_ref, wqkv_ref, bqkv_ref, q_ref, k_ref, v_ref):
    x = x_ref[0]                                               # (bl, D) bf16
    d = x.shape[1]
    qkv = jnp.dot(x, wqkv_ref[...], preferred_element_type=jnp.float32)
    qkv = (qkv + bqkv_ref[...]).astype(jnp.bfloat16)           # (bl, 3D)
    q_ref[0] = qkv[:, :d]          # scale 1/sqrt(dt) already folded into Wq/bq
    k_ref[0] = qkv[:, d:2 * d]
    v_ref[0] = qkv[:, 2 * d:]


# --------------------------------------------------------------------------- #
# kernel 2: flash attention (online softmax over key blocks) + out projection
# --------------------------------------------------------------------------- #
def _flash_attn_kernel(mask_ref, q_ref, k_ref, v_ref, wc_ref, bc_ref,
                       o_ref, m_sc, l_sc, acc_sc, *, n_head):
    ki = pl.program_id(2)

    @pl.when(ki == 0)
    def _():
        m_sc[...] = jnp.full(m_sc.shape, -jnp.inf, jnp.float32)
        l_sc[...] = jnp.zeros(l_sc.shape, jnp.float32)
        acc_sc[...] = jnp.zeros(acc_sc.shape, jnp.float32)

    qh = _split_heads(q_ref[0], n_head)                        # (H, tq, dt) bf16
    kh = _split_heads(k_ref[0], n_head)                        # (H, tk, dt) bf16
    vh = _split_heads(v_ref[0], n_head)                        # (H, tk, dt) bf16

    # Softmax scale is folded into Wq/bq -> no O(H*tq*tk) score multiply here.
    s = jnp.einsum("hqd,hkd->hqk", qh, kh,
                   preferred_element_type=jnp.float32)         # (H, tq, tk) f32

    # masked_fill(mask == 0, -10000): compare the int8 mask directly (no f32
    # cast of the mask), and REPLACE (not add) to match the reference exactly.
    s = jnp.where(mask_ref[0, 0][None, :, :] == 0, -10000.0, s)

    # ---- online softmax across key blocks -----------------------------------
    m_prev = m_sc[...]
    m_new = jnp.maximum(m_prev, jnp.max(s, axis=-1, keepdims=True))
    alpha = jnp.exp(m_prev - m_new)
    # NOTE: on v6e/v7x this exp could run on bf16 inputs (~2x EUP throughput);
    # kept f32 so the same kernel stays correct/fast on v5e (no bf16 EUP).
    p = jnp.exp(s - m_new)
    l_sc[...] = alpha * l_sc[...] + jnp.sum(p, axis=-1, keepdims=True)
    acc_sc[...] = alpha * acc_sc[...] + jnp.einsum(
        "hqk,hkd->hqd", p.astype(jnp.bfloat16), vh,
        preferred_element_type=jnp.float32)
    m_sc[...] = m_new

    @pl.when(ki == pl.num_programs(2) - 1)
    def _():
        ctx = acc_sc[...] * pl.reciprocal(l_sc[...], approx=True)  # EUP recip
        concat = _merge_heads(ctx.astype(jnp.bfloat16))            # (tq, D)
        out = jnp.dot(concat, wc_ref[...],
                      preferred_element_type=jnp.float32) + bc_ref[...]
        # dropout(p=0.02) == identity (eval mode)
        o_ref[0] = out.astype(o_ref.dtype)


# --------------------------------------------------------------------------- #
# wrappers
# --------------------------------------------------------------------------- #
def prepare_params(params, n_head):
    """One-time weight preparation (hoisted out of the forward call):
    fuse Q/K/V weights, cast to bf16, fold the softmax scale into Wq/bq."""
    d_model = params["wq"].shape[0]
    dt = d_model // n_head
    scale = 1.0 / math.sqrt(dt)
    wqkv = jnp.concatenate(
        [params["wq"] * scale, params["wk"], params["wv"]],
        axis=1).astype(jnp.bfloat16)                           # (D, 3D)
    bqkv = jnp.concatenate(
        [params["bq"] * scale, params["bk"], params["bv"]],
        axis=1).astype(jnp.float32)                            # (1, 3D)
    return {
        "wqkv": wqkv,
        "bqkv": bqkv,
        "wc": params["wc"].astype(jnp.bfloat16),
        "bc": params["bc"].astype(jnp.float32),
    }


def encoder_layer_forward(embed, src_mask, prepared, n_head,
                          block_q=256, block_k=256, block_seq=256):
    """EncoderLayer.forward: returns dropout(MHA(embed, embed, embed, src_mask)).
    Block targets (256) are sized so the working set fits v7x's 64 MiB VMEM as
    well as v5e/v6e; pass smaller blocks to shrink further."""
    B, L, D = embed.shape
    assert D % n_head == 0, "d_model must be divisible by n_head"
    dt = D // n_head

    embed_bf = embed.astype(jnp.bfloat16)
    # int8 mask: 4x less HBM traffic than f32.  (If the mask is padding-style --
    # identical query rows -- a (B, 1, 1, L) key mask would cut this to O(L).)
    mask_i8 = (src_mask != 0).astype(jnp.int8)

    # ---------------- kernel 1: fused QKV projection -------------------------
    bl = _pick_block(L, block_seq, 8)
    D3 = prepared["wqkv"].shape[1]
    qkv_sds = jax.ShapeDtypeStruct((B, L, D), jnp.bfloat16)
    seq_out_spec = pl.BlockSpec((1, bl, D), lambda b, i: (b, i, 0))
    q, k, v = pl.pallas_call(
        _qkv_proj_kernel,
        out_shape=(qkv_sds, qkv_sds, qkv_sds),
        grid=(B, L // bl),
        in_specs=[
            pl.BlockSpec((1, bl, D), lambda b, i: (b, i, 0)),   # embed block
            _const_spec((D, D3)),                               # Wqkv (bf16)
            _const_spec((1, D3)),                               # bqkv (f32)
        ],
        out_specs=(seq_out_spec, seq_out_spec, seq_out_spec),
        compiler_params=_compiler_params(("parallel", "parallel")),
    )(embed_bf, prepared["wqkv"], prepared["bqkv"])

    # ---------------- kernel 2: flash attention + output projection ----------
    tq = _pick_block(L, block_q, 8)     # query blocks: extra "parallel" axis (v7x)
    tk = _pick_block(L, block_k, 128)   # key blocks: lane-aligned mask tiles
    kernel = functools.partial(_flash_attn_kernel, n_head=n_head)
    attn = pl.pallas_call(
        kernel,
        out_shape=jax.ShapeDtypeStruct((B, L, D), jnp.float32),
        grid=(B, L // tq, L // tk),
        in_specs=[
            pl.BlockSpec((1, 1, tq, tk), lambda b, qi, ki: (b, 0, qi, ki)),
            pl.BlockSpec((1, tq, D), lambda b, qi, ki: (b, qi, 0)),   # q
            pl.BlockSpec((1, tk, D), lambda b, qi, ki: (b, ki, 0)),   # k
            pl.BlockSpec((1, tk, D), lambda b, qi, ki: (b, ki, 0)),   # v
            _const_spec((D, D)),                                      # Wc
            _const_spec((1, D)),                                      # bc
        ],
        # Output block is revisited across the key axis (accumulator pattern);
        # lane-dense when D is a multiple of 128 (production sizes).
        out_specs=pl.BlockSpec((1, tq, D), lambda b, qi, ki: (b, qi, 0)),
        scratch_shapes=[
            pltpu.VMEM((n_head, tq, 1), jnp.float32),    # running row max
            pltpu.VMEM((n_head, tq, 1), jnp.float32),    # running denominator
            pltpu.VMEM((n_head, tq, dt), jnp.float32),   # running context acc
        ],
        compiler_params=_compiler_params(("parallel", "parallel", "arbitrary")),
    )(mask_i8, q, k, v, prepared["wc"], prepared["bc"])
    return attn


# --------------------------------------------------------------------------- #
# params / pure-JAX reference
# --------------------------------------------------------------------------- #
def make_params(key, d_model):
    ks = jax.random.split(key, 8)
    std = 0.02
    return {
        "wq": jax.random.normal(ks[0], (d_model, d_model), jnp.float32) * std,
        "bq": jax.random.normal(ks[1], (1, d_model), jnp.float32) * std,
        "wk": jax.random.normal(ks[2], (d_model, d_model), jnp.float32) * std,
        "bk": jax.random.normal(ks[3], (1, d_model), jnp.float32) * std,
        "wv": jax.random.normal(ks[4], (d_model, d_model), jnp.float32) * std,
        "bv": jax.random.normal(ks[5], (1, d_model), jnp.float32) * std,
        "wc": jax.random.normal(ks[6], (d_model, d_model), jnp.float32) * std,
        "bc": jax.random.normal(ks[7], (1, d_model), jnp.float32) * std,
    }


def reference_forward(embed, src_mask, params, n_head):
    """Pure-JAX f32 reference mirroring MultiHeadAttention.forward."""
    B, L, D = embed.shape
    dt = D // n_head
    q = embed @ params["wq"] + params["bq"]
    k = embed @ params["wk"] + params["bk"]
    v = embed @ params["wv"] + params["bv"]

    def split(t):
        return t.reshape(B, L, n_head, dt).transpose(0, 2, 1, 3)

    qh, kh, vh = split(q), split(k), split(v)
    score = (qh @ kh.transpose(0, 1, 3, 2)) / math.sqrt(dt)
    score = jnp.where(src_mask == 0, -10000.0, score)
    p = jax.nn.softmax(score, axis=-1)
    ctx = (p @ vh).transpose(0, 2, 1, 3).reshape(B, L, D)
    return ctx @ params["wc"] + params["bc"]


# --------------------------------------------------------------------------- #
if __name__ == "__main__":
    # NOTE: toy shapes for correctness only -- at B=2, L=8, D=32 the kernels are
    # pure launch/step overhead; tune/benchmark tiling at production L/D.
    B, L, D, H = 2, 8, 32, 4

    key = jax.random.PRNGKey(0)
    k_embed, k_params = jax.random.split(key)
    embed = jax.random.normal(k_embed, (B, L, D), jnp.float32)

    # padding-style src mask: (B, 1, L, L); batch 1 masks its last 2 key positions
    mask = jnp.ones((B, 1, L, L), jnp.float32)
    mask = mask.at[1, 0, :, L - 2:].set(0.0)

    params = make_params(k_params, D)
    prepared = prepare_params(params, n_head=H)   # one-time fusion/cast (hoisted)

    out = encoder_layer_forward(embed, mask, prepared, n_head=H)
    out = jax.block_until_ready(out)
    assert out.shape == (B, L, D)

    ref = reference_forward(embed, mask, params, H)
    max_err = float(jnp.max(jnp.abs(out - ref)))
    assert jnp.allclose(out, ref, atol=5e-2, rtol=5e-2), max_err

    print("KERNEL_OK")
</pallas_src>

<mosaic_0001>
module attributes {stable_mosaic.version = 11 : i64} {
  func.func @_qkv_proj_kernel(%arg0: i32, %arg1: i32, %arg2: memref<1x8x32xbf16, #tpu.memory_space<vmem>>, %arg3: memref<32x96xbf16, #tpu.memory_space<vmem>>, %arg4: memref<1x96xf32, #tpu.memory_space<vmem>>, %arg5: memref<1x8x32xbf16, #tpu.memory_space<vmem>>, %arg6: memref<1x8x32xbf16, #tpu.memory_space<vmem>>, %arg7: memref<1x8x32xbf16, #tpu.memory_space<vmem>>) attributes {dimension_semantics = [#tpu.dimension_semantics<parallel>, #tpu.dimension_semantics<parallel>], iteration_bounds = array<i64: 2, 1>, scalar_prefetch = 0 : i64, scratch_operands = 0 : i64, tpu.core_type = #tpu.core_type<tc>, window_params = [{transform_indices = @transform_0, window_bounds = array<i64: 1, 8, 32>}, {pipeline_mode = #tpu.pipeline_mode<synchronous>, transform_indices = @transform_1, window_bounds = array<i64: 32, 96>}, {pipeline_mode = #tpu.pipeline_mode<synchronous>, transform_indices = @transform_2, window_bounds = array<i64: 1, 96>}, {transform_indices = @transform_3, window_bounds = array<i64: 1, 8, 32>}, {transform_indices = @transform_4, window_bounds = array<i64: 1, 8, 32>}, {transform_indices = @transform_5, window_bounds = array<i64: 1, 8, 32>}]} {
    %c0 = arith.constant 0 : index
    %c0_0 = arith.constant 0 : index
    %c0_1 = arith.constant 0 : index
    %0 = vector.load %arg2[%c0, %c0_0, %c0_1] : memref<1x8x32xbf16, #tpu.memory_space<vmem>>, vector<1x8x32xbf16>
    %1 = vector.shape_cast %0 : vector<1x8x32xbf16> to vector<8x32xbf16>
    %c0_2 = arith.constant 0 : index
    %c0_3 = arith.constant 0 : index
    %2 = vector.load %arg3[%c0_2, %c0_3] : memref<32x96xbf16, #tpu.memory_space<vmem>>, vector<32x96xbf16>
    %cst = arith.constant dense<0.000000e+00> : vector<8x96xf32>
    %3 = tpu.matmul %1, %2, %cst {dimension_numbers = #tpu.dot_dimension_numbers<[1], [0], [0], [1], [0, 0, 1, 1], [], []>} : vector<8x32xbf16>, vector<32x96xbf16>, vector<8x96xf32> -> vector<8x96xf32>
    %c0_4 = arith.constant 0 : index
    %c0_5 = arith.constant 0 : index
    %4 = vector.load %arg4[%c0_4, %c0_5] : memref<1x96xf32, #tpu.memory_space<vmem>>, vector<1x96xf32>
    %5 = vector.broadcast %4 : vector<1x96xf32> to vector<8x96xf32>
    %6 = arith.addf %3, %5 : vector<8x96xf32>
    %7 = arith.truncf %6 : vector<8x96xf32> to vector<8x96xbf16>
    %8 = vector.extract_strided_slice %7 {offsets = [0, 0], sizes = [8, 32], strides = [1, 1]} : vector<8x96xbf16> to vector<8x32xbf16>
    %c0_6 = arith.constant 0 : index
    %c0_7 = arith.constant 0 : index
    %c0_8 = arith.constant 0 : index
    %9 = vector.load %arg5[%c0_6, %c0_7, %c0_8] : memref<1x8x32xbf16, #tpu.memory_space<vmem>>, vector<1x8x32xbf16>
    %10 = vector.shape_cast %9 : vector<1x8x32xbf16> to vector<8x32xbf16>
    %11 = vector.shape_cast %8 : vector<8x32xbf16> to vector<1x8x32xbf16>
    tpu.vector_store %arg5[%c0_6, %c0_7, %c0_8], %11 {strides = array<i32>} : memref<1x8x32xbf16, #tpu.memory_space<vmem>>, vector<1x8x32xbf16>,
    %12 = vector.extract_strided_slice %7 {offsets = [0, 32], sizes = [8, 32], strides = [1, 1]} : vector<8x96xbf16> to vector<8x32xbf16>
    %c0_9 = arith.constant 0 : index
    %c0_10 = arith.constant 0 : index
    %c0_11 = arith.constant 0 : index
    %13 = vector.load %arg6[%c0_9, %c0_10, %c0_11] : memref<1x8x32xbf16, #tpu.memory_space<vmem>>, vector<1x8x32xbf16>
    %14 = vector.shape_cast %13 : vector<1x8x32xbf16> to vector<8x32xbf16>
    %15 = vector.shape_cast %12 : vector<8x32xbf16> to vector<1x8x32xbf16>
    tpu.vector_store %arg6[%c0_9, %c0_10, %c0_11], %15 {strides = array<i32>} : memref<1x8x32xbf16, #tpu.memory_space<vmem>>, vector<1x8x32xbf16>,
    %16 = vector.extract_strided_slice %7 {offsets = [0, 64], sizes = [8, 32], strides = [1, 1]} : vector<8x96xbf16> to vector<8x32xbf16>
    %c0_12 = arith.constant 0 : index
    %c0_13 = arith.constant 0 : index
    %c0_14 = arith.constant 0 : index
    %17 = vector.load %arg7[%c0_12, %c0_13, %c0_14] : memref<1x8x32xbf16, #tpu.memory_space<vmem>>, vector<1x8x32xbf16>
    %18 = vector.shape_cast %17 : vector<1x8x32xbf16> to vector<8x32xbf16>
    %19 = vector.shape_cast %16 : vector<8x32xbf16> to vector<1x8x32xbf16>
    tpu.vector_store %arg7[%c0_12, %c0_13, %c0_14], %19 {strides = array<i32>} : memref<1x8x32xbf16, #tpu.memory_space<vmem>>, vector<1x8x32xbf16>,
    return
  }
  func.func @transform_0(%arg0: i32, %arg1: i32) -> (i32, i32, i32) {
    %c0_i32 = arith.constant 0 : i32
    %c0_i32_0 = arith.constant 0 : i32
    return %arg0, %arg1, %c0_i32 : i32, i32, i32
  }
  func.func @transform_1(%arg0: i32, %arg1: i32) -> (i32, i32) {
    %c0_i32 = arith.constant 0 : i32
    %c0_i32_0 = arith.constant 0 : i32
    %c0_i32_1 = arith.constant 0 : i32
    return %c0_i32, %c0_i32_0 : i32, i32
  }
  func.func @transform_2(%arg0: i32, %arg1: i32) -> (i32, i32) {
    %c0_i32 = arith.constant 0 : i32
    %c0_i32_0 = arith.constant 0 : i32
    %c0_i32_1 = arith.constant 0 : i32
    return %c0_i32, %c0_i32_0 : i32, i32
  }
  func.func @transform_3(%arg0: i32, %arg1: i32) -> (i32, i32, i32) {
    %c0_i32 = arith.constant 0 : i32
    %c0_i32_0 = arith.constant 0 : i32
    return %arg0, %arg1, %c0_i32 : i32, i32, i32
  }
  func.func @transform_4(%arg0: i32, %arg1: i32) -> (i32, i32, i32) {
    %c0_i32 = arith.constant 0 : i32
    %c0_i32_0 = arith.constant 0 : i32
    return %arg0, %arg1, %c0_i32 : i32, i32, i32
  }
  func.func @transform_5(%arg0: i32, %arg1: i32) -> (i32, i32, i32) {
    %c0_i32 = arith.constant 0 : i32
    %c0_i32_0 = arith.constant 0 : i32
    return %arg0, %arg1, %c0_i32 : i32, i32, i32
  }
}

</mosaic_0001>

<bundles_post_ra>
// kernel: tpu_custom_call.1
= control target key start
LH: loop header
LB: loop body
LE: loop exit
PB: predicated region body
PF: predicated region fallthrough
CT: control target
= control target key end

     0   :  { %11 = vsyncpa [#allocation3], 0  ;;  %s1258_s0 = inlined_call_operand.hbm [shape: bf16[2,8,32], index: 0, kind: input, shape index: {}]   ;;  %s1259_s1 = inlined_call_operand.hbm [shape: bf16[32,96], index: 1, kind: input, shape index: {}]   ;;  %s1260_s2 = inlined_call_operand.vmem [shape: f32[1,96], index: 2, kind: input, shape index: {}]   ;;  %s1261_s3 = inlined_call_operand.hbm [shape: bf16[2,8,32], index: 3, kind: output, shape index: {0}]   ;;  %s1262_s4 = inlined_call_operand.hbm [shape: bf16[2,8,32], index: 4, kind: output, shape index: {1}]   ;;  %s1263_s5 = inlined_call_operand.hbm [shape: bf16[2,8,32], index: 5, kind: output, shape index: {2}]  }
   0x1   :  { %13 = vsyncpa [#allocation3 + $0x1], 0 }
   0x2   :  { %14 = vsyncpa [#allocation6], 0 }
   0x3   :  { %15 = vsyncpa [#allocation4], 0 }
   0x4   :  { %17 = vsyncpa [#allocation4 + $0x1], 0 }
   0x5   :  { %18 = vsyncpa [#allocation9], 0 }
   0x6   :  { %20 = vsyncpa [#allocation9 + $0x1], 0  ;;  %s959_s18 = smov 0   ;;  %s961_s19 = smov 0  }
   0x7   :  { %s963_s20 = smov 0   ;;  %s965_s21 = smov 0  }
   0x8   :  { %s967_s22 = smov 0   ;;  %s969_s23 = smov 0  }
   0x9 LB: > { %s990_s24 = sadd.s32 4294967295, %s916_s23   ;;  %s1267_s25 = sadd.s32 4294967294, %s916_s23   ;;  %s916_s23 = sphi %s969_s23, %s26_s23   ;;  %s912_s22 = sphi %s967_s22, %s1287_s22   ;;  %s908_s21 = sphi %s965_s21, %s1286_s21   ;;  %s904_s20 = sphi %s963_s20, %s1285_s20   ;;  %s900_s19 = sphi %s961_s19, %s1284_s19   ;;  %s896_s18 = sphi %s959_s18, %s1283_s18  }
   0xa   : > { %p60_p0 = scmp.ne.s32.totalorder %s900_s19, %s896_s18  ;;  %p1264_p1 = scmp.eq.s32.totalorder %s990_s24, 0 }
   0xb   : > { %p134_p3 = scmp.eq.s32.totalorder %s1267_s25, 1  ;;  %p585_p5 = scmp.ge.s32.totalorder %s916_s23, 1 }
   0xc   : > { %p1001_p4 = por %p1264_p1, %p60_p0  ;;  %p197_p7 = scmp.lt.s32.totalorder %s916_s23, 3 }
   0xd   : > { %p1006_p6 = por %p134_p3, %p60_p0  ;;  %s918_s29 = smov [#allocation5]  }
   0xe   : > { %s1268_s26 = scalar_select %p1001_p4, 1, 0 }
   0xf   : > { %s1269_s27 = scalar_select %p1006_p6, 1, 0 }
  0x10   : > { %p1011_p8 = pnand %p585_p5, %p197_p7  ;;  %s209_s30 = sshll.u32 %s918_s29, 4  ;;  %s210_s30 = int_to_ptr.vmem [resolvable:$true] %s209_s30 }
  0x11   : > { %s38_s7 = sadd.s32 1, %s912_s22  ;;  %s712_s10 = scalar_lea.hbm %s1259_s1, 256 }
  0x12   : > { %s1270_s28 = scalar_select %p1011_p8, 1, 0 }
  0x13   : > { %p633_p9 = pneg %p1011_p8  ;;  %p713_p12 = scmp.ne.s32.totalorder %s1259_s1, %s712_s10 }
  0x14   : > { %p719_p5 = scmp.lt.u32.totalorder %s712_s10, %s1259_s1 }
  0x15   : > { %p1020_p11 = pnand %p633_p9, %p1264_p1 }
  0x17   : > { %p714_p13 = pneg %p1020_p11 }
  0x19   : > { %p715_p0 = pnand %p714_p13, %p713_p12 }
  0x1b   : > { %p716_p3 = pneg %p715_p0 }
  0x1d   : > { %p721_p7 = pnand %p719_p5, %p716_p3 }
  0x1f   : > { %724 = shalt.err (!%p721_p7)
}
  0x20   : > { %s725_s15 = scalar_lea.vmem %s210_s30, 256  ;;  %p733_p2 = scmp.lt.s32.totalorder %s210_s30, %s210_s30 }
  0x21   : > { %p726_p9 = scmp.ne.s32.totalorder %s210_s30, %s725_s15  ;;  %p734_p6 = scmp.lt.s32.totalorder %s725_s15, %s725_s15 }
  0x23   : > { %p728_p10 = pnand %p726_p9, %p714_p13  ;;  %p735_p4 = por %p734_p6, %p733_p2 }
  0x25   : > { %p729_p1 = pneg %p728_p10 }
  0x27   : > { %p736_p8 = pnand %p735_p4, %p729_p1 }
  0x29   : > { %739 = shalt.err (!%p736_p8)
}
  0x2a   : > { %s919_s16 = smov 64   ;;  %s920_s17 = smov 4  }
  0x2b   : > { %636 = dma.hbm_to_vmem [thread:$0]  (!%p1020_p11), %s1259_s1, 256, %s210_s30, [#allocation6], %s919_s16, %s919_s16, %s920_s17  }
  0x2c   : > { %p40_p1 = scmp.ge.s32.totalorder %s38_s7, 2  ;;  %s47_s9 = sadd.s32 1, %s904_s20 }
  0x2d   : > { %p54_p2 = scmp.ne.s32.totalorder %s904_s20, %s900_s19  ;;  %p55_p4 = scmp.eq.s32.totalorder %s916_s23, 0 }
  0x2e   : > { %s1289_s7 = smov (%p40_p1, %s38_s7), 0  ;;  %p1273_p8 = scmp.eq.s32.totalorder %s990_s24, 1 }
  0x2f   : > { %p1047_p6 = por %p55_p4, %p54_p2  ;;  %s42_s6 = ssub.s32 %s912_s22, %s1289_s7 }
  0x30   : > { %p1053_p10 = por %p1273_p8, %p54_p2  ;;  %p652_p12 = scmp.lt.s32.totalorder %s916_s23, 2 }
  0x31   : > { %p45_p11 = scmp.eq.s32.totalorder %s42_s6, 0  ;;  %s226_s30 = sand.u32 1, %s904_s20  }
  0x32   : > { %s588_s12 = sshll.u32 %s226_s30, 2  ;;  %s589_s14 = sshll.u32 %s912_s22, 6 }
  0x33   : > { %s1062_s13 = scalar_select %p45_p11, %s904_s20, %s47_s9  }
  0x34   : > { %s1068_s17 = scalar_lea.hbm %s1258_s0, %s589_s14  ;;  %s230_s29 = scalar_lea.vmem [#allocation2], %s588_s12 }
  0x35   : > { %s238_s8 = sshll.u32 %s230_s29, 4  ;;  %p1074_p13 = pnand %p652_p12, %p1047_p6  ;;  %s1070_s8 = int_to_ptr.vmem [resolvable:$true] %s238_s8 }
  0x36   : > { %s227_s9 = scalar_lea.sflag [#allocation3], %s226_s30  ;;  %s740_s25 = scalar_lea.hbm %s1068_s17, 64 }
  0x37   : > { %p741_p0 = scmp.ne.s32.totalorder %s1068_s17, %s740_s25  ;;  %p742_p3 = pneg %p1074_p13 }
  0x38   : > { %s745_s15 = scalar_lea.hbm %s1258_s0, 128  ;;  %p746_p9 = scmp.lt.u32.totalorder %s1068_s17, %s1258_s0 }
  0x39   : > { %p743_p5 = pnand %p742_p3, %p741_p0  ;;  %p747_p1 = scmp.lt.u32.totalorder %s745_s15, %s740_s25 }
  0x3a   : > { %p749_p4 = scmp.lt.u32.totalorder %s740_s25, %s1068_s17 }
  0x3b   : > { %p744_p7 = pneg %p743_p5  ;;  %p748_p2 = por %p747_p1, %p746_p9 }
  0x3d   : > { %p750_p6 = por %p749_p4, %p748_p2 }
  0x3f   : > { %p751_p8 = pnand %p750_p6, %p744_p7 }
  0x41   : > { %754 = shalt.err (!%p751_p8)
}
  0x42   : > { %s755_s30 = scalar_lea.vmem %s1070_s8, 64  ;;  %s921_s29 = smov [#allocation2]  }
  0x43   : > { %p756_p12 = scmp.ne.s32.totalorder %s1070_s8, %s755_s30  ;;  %s760_s12 = sshll.u32 %s921_s29, 4  ;;  %s761_s12 = int_to_ptr.vmem [resolvable:$false] %s760_s12 }
  0x44   : > { %s762_s14 = scalar_lea.vmem %s761_s12, 128  ;;  %p763_p5 = scmp.lt.s32.totalorder %s1070_s8, %s761_s12 }
  0x45   : > { %p758_p11 = pnand %p756_p12, %p742_p3  ;;  %p764_p9 = scmp.lt.s32.totalorder %s762_s14, %s755_s30 }
  0x47   : > { %p759_p0 = pneg %p758_p11  ;;  %p765_p1 = por %p764_p9, %p763_p5 }
  0x49   : > { %p766_p2 = pnand %p765_p1, %p759_p0 }
  0x4b   : > { %769 = shalt.err (!%p766_p2)
}
  0x4c   : > { %640 = dma.hbm_to_vmem [thread:$0]  (!%p1074_p13), %s1068_s17, 64, %s1070_s8, %s227_s9  }
  0x4d   : > { %p1276_p7 = scmp.ne.s32.totalorder %s1270_s28, 0 }
  0x4e   : > { %s1106_s25 = sand.u32 (!%p1276_p7), 1, %s900_s19   ;;  %p1277_p3 = scmp.ne.s32.totalorder (!%p1276_p7), %s1268_s26, 0 }
  0x4f   : > { %247 = sbr.rel (%p1276_p7) target bundleno = 467 (0x1d3), region = 32  ;;  %s1109_s15 = sshll.u32 (!%p1276_p7), %s1106_s25, 2 }
  0x50   : > { %s250_s10 = scalar_lea.sflag (!%p1276_p7), [#allocation3], %s1106_s25  ;;  %s253_s16 = scalar_lea.vmem (!%p1276_p7), [#allocation2], %s1109_s15 }
  0x56   : > { %879 = dma.done.wait (%p1277_p3), %s250_s10, 64  }
  0x57   : > { %881 = vsyncadd (%p1277_p3), %s250_s10, 4294967232  ;;  %p1278_p13 = scmp.eq.s32.totalorder %s990_s24, 0 }
  0x59   : > { %883 = dma.done.wait (%p1278_p13), [#allocation6], 256   ;;  %p1279_p4 = pmov %p1278_p13 }
  0x5a   : > { %v922_v0 = vmov 0.0   ;;  %vm923_vm0 = vmmov 0   ;;  %v710_v1 = vld [vmem:[#allocation5] sm:$0xff]   ;;  %v711_v2 = vld [vmem:[#allocation5 + $0x8] sm:$0xff]   ;;  %v295_v3 = vld [vmem:[%s253_s16] sm:$0xf] }
  0x5b   : > { %885 = vsyncadd (%p1279_p4), [#allocation6], 4294967040  ;;  %613 = vmatprep.subr.bf16.mxu0 %v922_v0  ;;  %617 = vmatprep.mubr.msk.bf16.mxu0 %vm923_vm0, %v922_v0  ;;  %vm319_vm1 = vcmask 261120   ;;  %v596_v4 = vld [vmem:[%s1260_s2] ss:$0 sm:$0xff]  ;;  %s1125_s17 = sshll.u32 %s908_s21, 6 }
  0x5c   : > { %614 = vmatpush3.bf16.msra.mxu0 %v710_v1  ;;  %s279_s8 = scalar_lea.vmem [#allocation7], %s1109_s15  ;;  %vm364_vm2 = vcmask 257024   ;;  %s1132_s29 = scalar_lea.hbm %s1261_s3, %s1125_s17 }
  0x5d   : > { %615 = vmatprep.subr.bf16.mxu0 %v922_v0  ;;  %s402_s6 = sshll.u32 %s279_s8, 4  ;;  %s924_s21 = smov 96   ;;  %s1134_s6 = int_to_ptr.vmem [resolvable:$true] %s402_s6 }
  0x5e   : > { %s378_s12 = scalar_lea.sflag [#allocation4], %s1106_s25  ;;  %s770_s14 = scalar_lea.vmem %s1134_s6, 64 }
  0x5f   : > { %p771_p6 = scmp.ne.s32.totalorder %s1134_s6, %s770_s14  ;;  %s925_s10 = smov [#allocation7]  }
  0x60   : > { %616 = vmatpush3.bf16.msra.mxu0 %v711_v2  ;;  %s774_s16 = sshll.u32 %s925_s10, 4  ;;  %s775_s16 = int_to_ptr.vmem [resolvable:$false] %s774_s16 }
  0x61   : > { %p772_p8 = pnand %p771_p6, %p1053_p10  ;;  %s776_s26 = scalar_lea.vmem %s775_s16, 128 }
  0x62   : > { %p777_p11 = scmp.lt.s32.totalorder %s1134_s6, %s775_s16  ;;  %p778_p0 = scmp.lt.s32.totalorder %s776_s26, %s770_s14 }
  0x63   : > { %618 = vmatmul.mubr.msk.bf16.vlgmr.msra.gmra.mrb[0].mxu0 %vm319_vm1, %v295_v3  ;;  %p773_p12 = pneg %p772_p8 }
  0x64   : > { %p779_p5 = por %p778_p0, %p777_p11 }
  0x66   : > { %p780_p9 = pnand %p779_p5, %p773_p12 }
 0x136   : > { %v357_v5 = vpop.f32.mrb[0].mxu0 }
 0x137   : > { %v358_v6 = vadd.f32 %v596_v4, %v357_v5  ;;  %v619_v7 = vpop.f32.mrb[1].mxu0 }
 0x138   : > { %v360_v8 = vpop.f32.mrb[2].mxu0 }
 0x139   : > { %v363_v9 = vpack.c.bf16 %v358_v6, %v358_v6  ;;  %v620_v10 = vpop.f32.mrb[3].mxu0 }
 0x13b   : > { %369 = vrot.lane.b32.xlu0 %v363_v9, %s924_s21  ;;  %365 = vst.msk [vmem:[%s279_s8] sm:$0xf] %vm364_vm2, %v363_v9 }
 0x13c   : > { %783 = shalt.err (!%p780_p9)
}
 0x13d   : > { %s784_s25 = scalar_lea.hbm %s1132_s29, 64  ;;  %s788_s9 = scalar_lea.hbm %s1261_s3, 128 }
 0x13e   : > { %p785_p1 = scmp.ne.s32.totalorder %s1132_s29, %s784_s25  ;;  %p789_p3 = scmp.lt.u32.totalorder %s1132_s29, %s1261_s3 }
 0x13f   : > { %p790_p13 = scmp.lt.u32.totalorder %s788_s9, %s784_s25  ;;  %p792_p6 = scmp.lt.u32.totalorder %s784_s25, %s1132_s29 }
 0x140   : > { %p786_p2 = pnand %p785_p1, %p1053_p10 }
 0x141   : > { %p791_p4 = por %p790_p13, %p789_p3 }
 0x142   : > { %p787_p7 = pneg %p786_p2 }
 0x143   : > { %p793_p8 = por %p792_p6, %p791_p4 }
 0x145   : > { %p794_p12 = pnand %p793_p8, %p787_p7 }
 0x147   : > { %797 = shalt.err (!%p794_p12)
}
 0x148   : > { %627 = dma.vmem_to_hbm [thread:$0]  (%p1053_p10), %s1134_s6, 64, %s1132_s29, %s378_s12  }
 0x149   : > { %s926_s14 = smov 64   ;;  %s382_s10 = sand.u32 1, %s990_s24  }
 0x14a   : > { %373 = vrot.lane.b32.xlu0 %v363_v9, %s926_s14  ;;  %s286_s16 = scalar_lea.vmem [#allocation8], %s1109_s15  ;;  %s1165_s8 = scalar_lea.hbm %s1262_s4, %s1125_s17 }
 0x14b   : > { %s416_s26 = sshll.u32 %s286_s16, 4  ;;  %s293_s9 = scalar_lea.vmem [#allocation10], %s1109_s15  ;;  %s1167_s26 = int_to_ptr.vmem [resolvable:$true] %s416_s26 }
 0x14c   : > { %s1172_s30 = sshll.u32 %s293_s9, 4  ;;  %s1175_s24 = scalar_lea.sflag [#allocation9], %s382_s10  ;;  %s1206_s30 = int_to_ptr.vmem [resolvable:$true] %s1172_s30 }
 0x14d   : > { %s798_s6 = scalar_lea.vmem %s1167_s26, 64  ;;  %s927_s29 = smov [#allocation8]  }
 0x14e   : > { %p799_p11 = scmp.ne.s32.totalorder %s1167_s26, %s798_s6  ;;  %s802_s12 = sshll.u32 %s927_s29, 4  ;;  %s803_s12 = int_to_ptr.vmem [resolvable:$false] %s802_s12 }
 0x14f   : > { %s804_s21 = scalar_lea.vmem %s803_s12, 128  ;;  %p805_p9 = scmp.lt.s32.totalorder %s1167_s26, %s803_s12 }
 0x150   : > { %p800_p0 = pnand %p799_p11, %p1053_p10  ;;  %p806_p1 = scmp.lt.s32.totalorder %s804_s21, %s798_s6 }
 0x152   : > { %p801_p5 = pneg %p800_p0  ;;  %p807_p2 = por %p806_p1, %p805_p9 }
 0x154   : > { %p808_p7 = pnand %p807_p2, %p801_p5 }
 0x1ad   : > { %v370_v11 = vpop.permute.xlu0 %369 }
 0x1ae   : > { %372 = vst.msk [vmem:[%s286_s16] sm:$0xf] %vm364_vm2, %v370_v11 }
 0x1af   : > { %811 = shalt.err (!%p808_p7)
}
 0x1b0   : > { %s812_s14 = scalar_lea.hbm %s1165_s8, 64  ;;  %s816_s25 = scalar_lea.hbm %s1262_s4, 128 }
 0x1b1   : > { %p813_p3 = scmp.ne.s32.totalorder %s1165_s8, %s812_s14  ;;  %p817_p6 = scmp.lt.u32.totalorder %s1165_s8, %s1262_s4 }
 0x1b2   : > { %p818_p8 = scmp.lt.u32.totalorder %s816_s25, %s812_s14  ;;  %p820_p11 = scmp.lt.u32.totalorder %s812_s14, %s1165_s8 }
 0x1b3   : > { %p814_p13 = pnand %p813_p3, %p1053_p10 }
 0x1b4   : > { %p819_p12 = por %p818_p8, %p817_p6 }
 0x1b5   : > { %p815_p4 = pneg %p814_p13 }
 0x1b6   : > { %p821_p0 = por %p820_p11, %p819_p12 }
 0x1b8   : > { %p822_p5 = pnand %p821_p0, %p815_p4 }
 0x1ba   : > { %825 = shalt.err (!%p822_p5)
}
 0x1bb   : > { %628 = dma.vmem_to_hbm [thread:$0]  (%p1053_p10), %s1167_s26, 64, %s1165_s8, %s1175_s24  }
 0x1bc   : > { %s1203_s21 = scalar_lea.hbm %s1263_s5, %s1125_s17  ;;  %v374_v12 = vpop.permute.xlu0 %373  ;;  %s826_s14 = scalar_lea.vmem %s1206_s30, 64 }
 0x1bd   : > { %376 = vst.msk [vmem:[%s293_s9] sm:$0xf] %vm364_vm2, %v374_v12  ;;  %p827_p9 = scmp.ne.s32.totalorder %s1206_s30, %s826_s14  ;;  %s928_s26 = smov [#allocation10]  }
 0x1be   : > { %s830_s8 = sshll.u32 %s928_s26, 4  ;;  %s831_s8 = int_to_ptr.vmem [resolvable:$false] %s830_s8 }
 0x1bf   : > { %p828_p1 = pnand %p827_p9, %p1053_p10  ;;  %s832_s10 = scalar_lea.vmem %s831_s8, 128 }
 0x1c0   : > { %p833_p7 = scmp.lt.s32.totalorder %s1206_s30, %s831_s8  ;;  %p834_p3 = scmp.lt.s32.totalorder %s832_s10, %s826_s14 }
 0x1c1   : > { %p829_p2 = pneg %p828_p1 }
 0x1c2   : > { %p835_p13 = por %p834_p3, %p833_p7 }
 0x1c4   : > { %p836_p4 = pnand %p835_p13, %p829_p2 }
 0x1c6   : > { %839 = shalt.err (!%p836_p4)
}
 0x1c7   : > { %s840_s15 = scalar_lea.hbm %s1203_s21, 64  ;;  %s844_s16 = scalar_lea.hbm %s1263_s5, 128 }
 0x1c8   : > { %p841_p6 = scmp.ne.s32.totalorder %s1203_s21, %s840_s15  ;;  %p845_p11 = scmp.lt.u32.totalorder %s1203_s21, %s1263_s5 }
 0x1c9   : > { %p846_p0 = scmp.lt.u32.totalorder %s844_s16, %s840_s15  ;;  %p848_p9 = scmp.lt.u32.totalorder %s840_s15, %s1203_s21 }
 0x1ca   : > { %p842_p8 = pnand %p841_p6, %p1053_p10 }
 0x1cb   : > { %p847_p5 = por %p846_p0, %p845_p11 }
 0x1cc   : > { %p843_p12 = pneg %p842_p8 }
 0x1cd   : > { %p849_p1 = por %p848_p9, %p847_p5 }
 0x1cf   : > { %p850_p2 = pnand %p849_p1, %p843_p12 }
 0x1d1   : > { %853 = shalt.err (!%p850_p2)
}
 0x1d2   : > { %629 = dma.vmem_to_hbm [thread:$0]  (%p1053_p10), %s1206_s30, 64, %s1203_s21, %s1175_s24  }
 0x1d3 PF: > { %s442_s29 = sand.u32 1, %s896_s18   ;;  %p1280_p7 = scmp.ne.s32.totalorder %s1269_s27, 0 }
 0x1d4   : > { %p1281_p3 = scmp.ge.s32.totalorder %s916_s23, 2  ;;  %s443_s6 = scalar_lea.sflag [#allocation4], %s442_s29 }
 0x1d6   : > { %p642_p13 = pnand %p1281_p3, %p1280_p7 }
 0x1d8   : > { %887 = dma.done.wait (!%p642_p13), %s443_s6, 64  }
 0x1d9   : > { %889 = vsyncadd (!%p642_p13), %s443_s6, 4294967232  ;;  %s1282_s12 = sadd.s32 4294967294, %s916_s23  }
 0x1da   : > { %s451_s14 = sand.u32 1, %s1282_s12  }
 0x1db   : > { %s452_s26 = scalar_lea.sflag [#allocation9], %s451_s14 }
 0x1dc   : > { %891 = dma.done.wait (!%p642_p13), %s452_s26, 128  }
 0x1dd   : > { %893 = vsyncadd (!%p642_p13), %s452_s26, 4294967168  ;;  %s26_s23 = sadd.s32 1, %s916_s23   ;;  %s1283_s18 = smov %s900_s19 }
 0x1de   : > { %p23_p10 = scmp.ge.s32.totalorder %s26_s23, 4   ;;  %s1284_s19 = smov %s904_s20 }
 0x1df   : > { %s1285_s20 = smov %s1062_s13  ;;  %s1286_s21 = smov %s912_s22 }
 0x1e0   : > { %s1287_s22 = smov %s1289_s7  ;;  %25 = sbr.rel (!%p23_p10) target bundleno = 9 (0x9), region = 113 }
 0x1e7   :  { %466 = vsyncpa [#allocation3], 1 }
 0x1e8   :  { %468 = vsyncpa [#allocation3 + $0x1], 1 }
 0x1e9   :  { %469 = vsyncpa [#allocation6], 1 }
 0x1ea   :  { %470 = vsyncpa [#allocation4], 1 }
 0x1eb   :  { %472 = vsyncpa [#allocation4 + $0x1], 1 }
 0x1ec   :  { %473 = vsyncpa [#allocation9], 1 }
 0x1ed   :  { %475 = vsyncpa [#allocation9 + $0x1], 1 }

</bundles_post_ra>
